<compile_context>
chip_gen: v7x
topology: tpu7x:2x2x1
jax: 0.10.0
libtpu: 0.0.40
codegen_flags: <defaults>
</compile_context>

<pallas_src>
import math

import numpy as np
import jax
import jax.numpy as jnp
from jax.experimental import pallas as pl
from jax.experimental.pallas import tpu as pltpu


# ----------------------------------------------------------------------------
# Pallas kernel: single-pass GEMM (full K) with fused bias + activation.
# ----------------------------------------------------------------------------
def _make_gemm_kernel(act):
    def kernel(a_ref, b_ref, bias_ref, o_ref):
        y = jnp.dot(a_ref[...], b_ref[...], preferred_element_type=jnp.float32)
        y = y + bias_ref[...]                       # (TM, TN) + (1, TN)
        if act == "leaky":
            y = jnp.where(y > 0, y, 0.2 * y)
        elif act == "relu":
            y = jnp.maximum(y, 0.0)
        elif act == "tanh":
            y = jnp.tanh(y)
        o_ref[...] = y.astype(o_ref.dtype)
    return kernel


_GEMM_KERNELS = {a: _make_gemm_kernel(a) for a in ("linear", "leaky", "relu", "tanh")}

_VMEM_LIMIT = 48 * 1024 * 1024      # explicit scoped-VMEM budget (safe on v5e/v6e/v7x)
_TM_BUDGET = 8 * 1024 * 1024        # per-step A/out/accumulator working-set target


def _round_up(x, m):
    return (x + m - 1) // m * m


def matmul_bias_act(a, w, bias, act="linear", out_dtype=jnp.bfloat16):
    """(M, K) @ (K, N) + bias[1, N] with fused activation.  a/w in bf16."""
    M, K = a.shape
    K2, N = w.shape
    assert K == K2, (a.shape, w.shape)
    a = a.astype(jnp.bfloat16)

    # N tile: full N unless the weight panel would be too large in VMEM.
    if N <= 512 and K * N * 2 <= (4 << 20):
        TN = N
    elif N % 256 == 0:
        TN = 256
    elif N % 128 == 0:
        TN = 128
    else:
        TN = N

    # M tile: as many rows as fit the working-set budget (lane padding to 128
    # accounted for), preferring a tile that divides M exactly (no pad copy).
    row_bytes = 2 * _round_up(K, 128) + (2 + 4) * _round_up(TN, 128)
    tm_cap = max(512, _TM_BUDGET // row_bytes // 8 * 8)
    if M <= tm_cap:
        TM = _round_up(M, 8)
    else:
        n0 = pl.cdiv(M, tm_cap)
        TM = _round_up(pl.cdiv(M, n0), 8)
        for n in range(n0, n0 + 8):
            t = _round_up(pl.cdiv(M, n), 8)
            if M % t == 0:
                TM = t
                break
    Mp = _round_up(M, TM)
    if Mp != M:
        a = jnp.pad(a, ((0, Mp - M), (0, 0)))

    grid = (Mp // TM, N // TN)
    out = pl.pallas_call(
        _GEMM_KERNELS[act],
        out_shape=jax.ShapeDtypeStruct((Mp, N), out_dtype),
        grid_spec=pltpu.PrefetchScalarGridSpec(
            num_scalar_prefetch=0,
            grid=grid,
            in_specs=[
                pl.BlockSpec((TM, K), lambda i, j: (i, 0)),
                pl.BlockSpec((K, TN), lambda i, j: (0, j)),
                pl.BlockSpec((1, TN), lambda i, j: (0, j)),
            ],
            out_specs=pl.BlockSpec((TM, TN), lambda i, j: (i, j)),
        ),
        compiler_params=pltpu.CompilerParams(
            dimension_semantics=("parallel", "parallel"),
            vmem_limit_bytes=_VMEM_LIMIT,
        ),
    )(a, w, bias)
    if Mp != M:
        out = out[:M]
    return out


# ----------------------------------------------------------------------------
# Layout glue (NHWC, bf16): patch gather, pooling, layer wrappers.
# ----------------------------------------------------------------------------
def im2col_nhwc(x, kh, kw, stride, padding, dilation=1):
    B, H, W, C = x.shape
    if padding:
        x = jnp.pad(x, ((0, 0), (padding, padding), (padding, padding), (0, 0)))
    Hp, Wp = x.shape[1], x.shape[2]
    OH = (Hp - dilation * (kh - 1) - 1) // stride + 1
    OW = (Wp - dilation * (kw - 1) - 1) // stride + 1
    taps = []
    for i in range(kh):
        for j in range(kw):
            r0, c0 = i * dilation, j * dilation
            taps.append(x[:, r0:r0 + stride * (OH - 1) + 1:stride,
                             c0:c0 + stride * (OW - 1) + 1:stride, :])
    cols = jnp.concatenate(taps, axis=-1)            # (B, OH, OW, kh*kw*C)
    return cols.reshape(B * OH * OW, kh * kw * C), OH, OW


def conv2d(x, layer, stride, padding, dilation=1, act="linear"):
    B = x.shape[0]
    cols, OH, OW = im2col_nhwc(x, 4, 4, stride, padding, dilation)
    y = matmul_bias_act(cols, layer["w"], layer["b"], act)
    return y.reshape(B, OH, OW, layer["w"].shape[1])


def conv_transpose_s2(x, layer, act="relu"):
    """ConvTranspose2d(k=4, stride=2, pad=1) as one sub-pixel GEMM + shuffle."""
    B, H, W, Cin = x.shape
    Cout = layer["w"].shape[1] // 4
    xp = jnp.pad(x, ((0, 0), (1, 1), (1, 1), (0, 0)))
    cols, _, _ = im2col_nhwc(xp, 3, 3, 1, 0, 1)             # (B*H*W, 9*Cin)
    y = matmul_bias_act(cols, layer["w"], layer["b"], act)  # (B*H*W, 4*Cout)
    y = y.reshape(B, H, W, 2, 2, Cout)
    return y.transpose(0, 1, 3, 2, 4, 5).reshape(B, 2 * H, 2 * W, Cout)


def conv_transpose_first(x_flat, layer, act="relu"):
    """ConvTranspose2d(k=2, stride=1, pad=0) on a 1x1 map: a plain GEMM."""
    B = x_flat.shape[0]
    Cout = layer["w"].shape[1] // 4
    y = matmul_bias_act(x_flat, layer["w"], layer["b"], act)
    return y.reshape(B, 2, 2, Cout)


def avg_pool4(x):
    B, H, W, C = x.shape
    y = x.reshape(B, H // 4, 4, W // 4, 4, C).astype(jnp.float32).mean(axis=(2, 4))
    return y.astype(x.dtype)


# ----------------------------------------------------------------------------
# Parameter packing (done once at init): BN fold, GEMM layout, bf16 cast.
# ----------------------------------------------------------------------------
def pack_conv(w, scale, bias=None):
    cout, cin, kh, kw = w.shape
    wm = (w.transpose(2, 3, 1, 0).reshape(kh * kw * cin, cout) * scale)
    b = jnp.zeros((cout,), jnp.float32) if bias is None else bias * scale
    return {"w": wm.astype(jnp.bfloat16), "b": b.reshape(1, cout).astype(jnp.float32)}


def pack_linear(w, b):
    return {"w": w.T.astype(jnp.bfloat16), "b": b.reshape(1, -1).astype(jnp.float32)}


def pack_convT_first(w, scale):
    cin, cout, kh, kw = w.shape               # (Cin, Cout, 2, 2)
    wm = (w.transpose(0, 2, 3, 1).reshape(cin, kh * kw * cout) * scale)
    return {"w": wm.astype(jnp.bfloat16),
            "b": jnp.zeros((1, kh * kw * cout), jnp.float32)}


# Sub-pixel selector: parity a, window offset u=a+p  ->  original kernel row i.
_SUBPIX = np.zeros((2, 3, 4), np.float32)
for _a, _rows in ((0, (3, 1)), (1, (2, 0))):
    for _p, _i in enumerate(_rows):
        _SUBPIX[_a, _a + _p, _i] = 1.0


def pack_convT_s2(w, scale):
    """(Cin, Cout, 4, 4) ConvT weight -> (9*Cin, 4*Cout) sub-pixel GEMM weight."""
    cin, cout = w.shape[0], w.shape[1]
    w3 = jnp.einsum("aui,bvj,nmij->uvnabm", _SUBPIX, _SUBPIX, w)   # (3,3,Cin,2,2,Cout)
    w3 = (w3 * scale).reshape(9 * cin, 4 * cout)
    return {"w": w3.astype(jnp.bfloat16),
            "b": jnp.zeros((1, 4 * cout), jnp.float32)}


def init_params(key, nef=8, ngf=8, nc=3, nz=100):
    s = 1.0 / math.sqrt(1.0 + 1e-5)          # BN fold (fresh running stats)
    keys = iter(jax.random.split(key, 40))

    def rn(shape, std=0.05):
        return jax.random.normal(next(keys), shape, jnp.float32) * std

    p = {}
    p["e1"] = pack_conv(rn((nef, nc, 4, 4)), s, rn((nef,)))
    p["e2"] = pack_conv(rn((nef * 2, nef, 4, 4)), s)
    p["e3a"] = pack_conv(rn((nef * 4, nef * 2, 4, 4)), s)
    p["e3b"] = pack_conv(rn((nef * 8, nef * 4, 4, 4)), s)
    p["a1"] = pack_conv(rn((nef, nc, 4, 4)), 1.0)          # atrous: no BN / act
    p["a2"] = pack_conv(rn((nef, nef, 4, 4)), 1.0)
    p["a3"] = pack_conv(rn((nef * 4, nef * 2, 4, 4)), 1.0)
    p["e4a"] = pack_conv(rn((nef * 32, nef * 16, 4, 4)), s)
    p["e4b"] = pack_conv(rn((nef * 64, nef * 32, 4, 4)), s)
    p["e4c"] = pack_conv(rn((nef * 128, nef * 64, 4, 4)), s)
    p["e4d"] = pack_conv(rn((nef * 256, nef * 128, 4, 4)), s)
    p["fc1"] = pack_linear(rn((nef * 64, nef * 256)), rn((nef * 64,)))
    p["fc2"] = pack_linear(rn((nz, nef * 64)), rn((nz,)))
    p["fc3"] = pack_linear(rn((nef * 64, nz)), rn((nef * 64,)))
    p["fc4"] = pack_linear(rn((nef * 256, nef * 64)), rn((nef * 256,)))
    p["d1a"] = pack_convT_first(rn((nef * 256, ngf * 128, 2, 2)), s)
    p["d1b"] = pack_convT_s2(rn((ngf * 128, ngf * 64, 4, 4)), s)
    p["d1c"] = pack_convT_s2(rn((ngf * 64, ngf * 32, 4, 4)), s)
    p["d1d"] = pack_convT_s2(rn((ngf * 32, ngf * 16, 4, 4)), s)
    p["d1e"] = pack_convT_s2(rn((ngf * 16, ngf * 8, 4, 4)), s)
    p["d2a"] = pack_convT_s2(rn((ngf * 24, ngf * 4, 4, 4)), s)
    p["d2b"] = pack_convT_s2(rn((ngf * 4, ngf * 2, 4, 4)), s)
    p["d2c"] = pack_convT_s2(rn((ngf * 2, ngf, 4, 4)), s)
    p["d2d"] = pack_convT_s2(rn((ngf, nc, 4, 4)), 1.0)     # last: Tanh, no BN
    return p


# ----------------------------------------------------------------------------
# Forward pass (mirrors Model512.forward, inference mode). Input/output NCHW.
# ----------------------------------------------------------------------------
def forward(p, x):
    B, nc_, _, _ = x.shape
    x = jnp.transpose(x, (0, 2, 3, 1)).astype(jnp.bfloat16)       # NHWC
    x1 = conv2d(x,  p["e1"], 2, 1, 1, "leaky")                    # (B,256,256,  8)
    x2 = conv2d(x1, p["e2"], 2, 1, 1, "leaky")                    # (B,128,128, 16)
    t  = conv2d(x2, p["e3a"], 2, 1, 1, "leaky")                   # (B, 64, 64, 32)
    x3 = conv2d(t,  p["e3b"], 2, 1, 1, "leaky")                   # (B, 32, 32, 64)
    a1 = conv2d(x,  p["a1"], 16, 0, 5)                            # (B, 32, 32,  8)
    a2 = conv2d(x1, p["a2"], 8, 1, 3)                             # (B, 32, 32,  8)
    a3 = conv2d(x2, p["a3"], 4, 0, 1)                             # (B, 32, 32, 32)
    a4 = avg_pool4(x2)                                            # (B, 32, 32, 16)
    xc = jnp.concatenate([x3, a1, a2, a3, a4], axis=-1)           # (B, 32, 32,128)
    y = conv2d(xc, p["e4a"], 2, 1, 1, "leaky")                    # (B, 16, 16, 256)
    y = conv2d(y,  p["e4b"], 2, 1, 1, "leaky")                    # (B,  8,  8, 512)
    y = conv2d(y,  p["e4c"], 2, 1, 1, "leaky")                    # (B,  4,  4,1024)
    y = conv2d(y,  p["e4d"], 1, 0, 1, "leaky")                    # (B,  1,  1,2048)
    x4 = y.reshape(B, -1)                                         # (B, 2048)
    # Dropout is the identity in inference mode.
    x5 = matmul_bias_act(x4, p["fc1"]["w"], p["fc1"]["b"])        # (B, 512)
    x6 = matmul_bias_act(x5, p["fc2"]["w"], p["fc2"]["b"])        # (B, 100)
    x7 = matmul_bias_act(x6, p["fc3"]["w"], p["fc3"]["b"])        # (B, 512)
    x8 = matmul_bias_act(x7, p["fc4"]["w"], p["fc4"]["b"])        # (B, 2048)
    d = conv_transpose_first(x8, p["d1a"], "relu")                # (B,  2,  2,1024)
    d = conv_transpose_s2(d, p["d1b"], "relu")                    # (B,  4,  4, 512)
    d = conv_transpose_s2(d, p["d1c"], "relu")                    # (B,  8,  8, 256)
    d = conv_transpose_s2(d, p["d1d"], "relu")                    # (B, 16, 16, 128)
    x9 = conv_transpose_s2(d, p["d1e"], "relu")                   # (B, 32, 32,  64)
    xd = jnp.concatenate([x9, xc], axis=-1)                       # (B, 32, 32, 192)
    o = conv_transpose_s2(xd, p["d2a"], "relu")                   # (B, 64, 64,  32)
    o = conv_transpose_s2(o,  p["d2b"], "relu")                   # (B,128,128,  16)
    o = conv_transpose_s2(o,  p["d2c"], "relu")                   # (B,256,256,   8)
    o = conv_transpose_s2(o,  p["d2d"], "tanh")                   # (B,512,512,   3)
    return jnp.transpose(o, (0, 3, 1, 2)).astype(jnp.float32)     # NCHW


if __name__ == "__main__":
    # --- quick GEMM-kernel self check against a jnp reference -----------------
    ka, kb = jax.random.split(jax.random.PRNGKey(1))
    A = jax.random.normal(ka, (100, 48), jnp.float32)
    Bm = jax.random.normal(kb, (48, 24), jnp.float32)
    bias = (jnp.arange(24, dtype=jnp.float32) * 0.01).reshape(1, 24)
    ref = jnp.maximum(
        A.astype(jnp.bfloat16).astype(jnp.float32)
        @ Bm.astype(jnp.bfloat16).astype(jnp.float32) + bias, 0.0)
    got = matmul_bias_act(A.astype(jnp.bfloat16), Bm.astype(jnp.bfloat16),
                          bias, "relu").astype(jnp.float32)
    assert bool(jnp.allclose(got, ref, rtol=0.05, atol=0.1)), "GEMM kernel mismatch"

    # --- full Model512 forward -------------------------------------------------
    key = jax.random.PRNGKey(0)
    pkey, xkey = jax.random.split(key)
    params = init_params(pkey)
    # Input shape implied by forward(): NCHW (B, 3, 512, 512); small batch B=1.
    x = jax.random.normal(xkey, (1, 3, 512, 512), jnp.float32)
    fwd = jax.jit(forward)
    out = jax.block_until_ready(fwd(params, x))
    assert out.shape == (1, 3, 512, 512), out.shape
    assert bool(jnp.all(jnp.isfinite(out)))
    print("KERNEL_OK")
</pallas_src>

<mosaic_0001>
module attributes {stable_mosaic.version = 11 : i64} {
  func.func @kernel(%arg0: i32, %arg1: i32, %arg2: memref<104x48xbf16, #tpu.memory_space<vmem>>, %arg3: memref<48x24xbf16, #tpu.memory_space<vmem>>, %arg4: memref<1x24xf32, #tpu.memory_space<vmem>>, %arg5: memref<104x24xbf16, #tpu.memory_space<vmem>>) attributes {dimension_semantics = [#tpu.dimension_semantics<parallel>, #tpu.dimension_semantics<parallel>], iteration_bounds = array<i64: 1, 1>, scalar_prefetch = 0 : i64, scratch_operands = 0 : i64, tpu.core_type = #tpu.core_type<tc>, window_params = [{transform_indices = @transform_0, window_bounds = array<i64: 104, 48>}, {transform_indices = @transform_1, window_bounds = array<i64: 48, 24>}, {transform_indices = @transform_2, window_bounds = array<i64: 1, 24>}, {transform_indices = @transform_3, window_bounds = array<i64: 104, 24>}]} {
    %c0 = arith.constant 0 : index
    %c0_0 = arith.constant 0 : index
    %0 = vector.load %arg2[%c0, %c0_0] : memref<104x48xbf16, #tpu.memory_space<vmem>>, vector<104x48xbf16>
    %c0_1 = arith.constant 0 : index
    %c0_2 = arith.constant 0 : index
    %1 = vector.load %arg3[%c0_1, %c0_2] : memref<48x24xbf16, #tpu.memory_space<vmem>>, vector<48x24xbf16>
    %cst = arith.constant dense<0.000000e+00> : vector<104x24xf32>
    %2 = tpu.matmul %0, %1, %cst {dimension_numbers = #tpu.dot_dimension_numbers<[1], [0], [0], [1], [0, 0, 1, 1], [], []>} : vector<104x48xbf16>, vector<48x24xbf16>, vector<104x24xf32> -> vector<104x24xf32>
    %c0_3 = arith.constant 0 : index
    %c0_4 = arith.constant 0 : index
    %3 = vector.load %arg4[%c0_3, %c0_4] : memref<1x24xf32, #tpu.memory_space<vmem>>, vector<1x24xf32>
    %4 = vector.broadcast %3 : vector<1x24xf32> to vector<104x24xf32>
    %5 = arith.addf %2, %4 : vector<104x24xf32>
    %cst_5 = arith.constant 0.000000e+00 : f32
    %6 = vector.broadcast %cst_5 : f32 to vector<104x24xf32>
    %7 = arith.maximumf %5, %6 : vector<104x24xf32>
    %8 = arith.truncf %7 : vector<104x24xf32> to vector<104x24xbf16>
    %c0_6 = arith.constant 0 : index
    %c0_7 = arith.constant 0 : index
    %9 = vector.load %arg5[%c0_6, %c0_7] : memref<104x24xbf16, #tpu.memory_space<vmem>>, vector<104x24xbf16>
    tpu.vector_store %arg5[%c0_6, %c0_7], %8 {strides = array<i32>} : memref<104x24xbf16, #tpu.memory_space<vmem>>, vector<104x24xbf16>,
    return
  }
  func.func @transform_0(%arg0: i32, %arg1: i32) -> (i32, i32) {
    %c0_i32 = arith.constant 0 : i32
    %c0_i32_0 = arith.constant 0 : i32
    return %arg0, %c0_i32 : i32, i32
  }
  func.func @transform_1(%arg0: i32, %arg1: i32) -> (i32, i32) {
    %c0_i32 = arith.constant 0 : i32
    %c0_i32_0 = arith.constant 0 : i32
    return %c0_i32, %arg1 : i32, i32
  }
  func.func @transform_2(%arg0: i32, %arg1: i32) -> (i32, i32) {
    %c0_i32 = arith.constant 0 : i32
    %c0_i32_0 = arith.constant 0 : i32
    return %c0_i32, %arg1 : i32, i32
  }
  func.func @transform_3(%arg0: i32, %arg1: i32) -> (i32, i32) {
    %c0_i32 = arith.constant 0 : i32
    return %arg0, %arg1 : i32, i32
  }
}

</mosaic_0001>

<bundles_post_ra>
// kernel: tpu_custom_call.1
= control target key start
LH: loop header
LB: loop body
LE: loop exit
PB: predicated region body
PF: predicated region fallthrough
CT: control target
= control target key end

     0   :  { %v392_v0 = vmov 0.0   ;;  %vm393_vm0 = vmmov 0   ;;  %vm92_vm1 = vcmask 392192   ;;  %vm268_vm2 = vcmask 191488   ;;  %s528_s1 = inlined_call_operand.vmem [shape: bf16[48,24], index: 1, kind: input, shape index: {}]   ;;  %s529_s0 = inlined_call_operand.vmem [shape: bf16[104,48], index: 0, kind: input, shape index: {}]   ;;  %s530_s2 = inlined_call_operand.vmem [shape: f32[1,24], index: 2, kind: input, shape index: {}]   ;;  %s531_s3 = inlined_call_operand.vmem [shape: bf16[104,24], index: 3, kind: output, shape index: {}]  }
   0x1   :  { %340 = vmatprep.subr.bf16.mxu0 %v392_v0  ;;  %v382_v1 = vld [vmem:[%s528_s1] sm:$0xff]   ;;  %374 = vmatprep.subr.bf16.mxu1 %v392_v0  ;;  %v383_v2 = vld [vmem:[%s528_s1 + $0x8] sm:$0xff]   ;;  %v384_v3 = vld [vmem:[%s528_s1 + $0x10] sm:$0xff]  }
   0x2   :  { %346 = vmatprep.mubr.msk.bf16.mxu0 %vm393_vm0, %v392_v0  ;;  %362 = vmatprep.mubr.msk.bf16.mxu1 %vm393_vm0, %v392_v0  ;;  %v385_v4 = vld [vmem:[%s529_s0] sm:$0xff]   ;;  %v387_v6 = vld [vmem:[%s529_s0 + $0x8] sm:$0xff]   ;;  %v389_v8 = vld [vmem:[%s529_s0 + $0x10] sm:$0xff]  }
   0x3   :  { %341 = vmatpush3.bf16.msra.mxu0 %v382_v1  ;;  %377 = vmatpush3.bf16.msra.mxu1 %v382_v1  ;;  %v386_v5 = vld [vmem:[%s529_s0 + $0x20] sm:$0xff]   ;;  %v388_v7 = vld [vmem:[%s529_s0 + $0x28] sm:$0xff]   ;;  %v390_v9 = vld [vmem:[%s529_s0 + $0x30] ss:$0 sps:$4 sm:$0xff]  }
   0x4   :  { %342 = vmatprep.subr.bf16.mxu0 %v392_v0  ;;  %375 = vmatprep.subr.bf16.mxu1 %v392_v0  ;;  %v391_v10 = vld [vmem:[%s529_s0 + $0x18] sm:$0xff]   ;;  %v461_v11 = vld [vmem:[%s530_s2] ss:$0 sm:$0xff] }
   0x7   :  { %343 = vmatpush3.bf16.msra.mxu0 %v383_v2  ;;  %378 = vmatpush3.bf16.msra.mxu1 %v383_v2 }
   0x8   :  { %344 = vmatprep.subr.bf16.mxu0 %v392_v0  ;;  %376 = vmatprep.subr.bf16.mxu1 %v392_v0 }
   0xb   :  { %345 = vmatpush3.bf16.msra.mxu0 %v384_v3  ;;  %379 = vmatpush3.bf16.msra.mxu1 %v384_v3 }
   0xe   :  { %347 = vmatmul.mubr.msk.bf16.vlgmr.msra.gmra.mrb[0].mxu0 %vm92_vm1, %v385_v4  ;;  %363 = vmatmul.mubr.msk.bf16.vlgmr.msra.gmra.mrb[0].mxu1 %vm92_vm1, %v386_v5 }
   0xf   :  { %350 = vmatprep.mubr.msk.bf16.mxu0 %vm393_vm0, %v392_v0  ;;  %366 = vmatprep.mubr.msk.bf16.mxu1 %vm393_vm0, %v392_v0 }
  0x16   :  { %351 = vmatmul.mubr.msk.bf16.gmra.mrb[4].mxu0 %vm92_vm1, %v387_v6  ;;  %367 = vmatmul.mubr.msk.bf16.gmra.mrb[4].mxu1 %vm92_vm1, %v388_v7 }
  0x17   :  { %354 = vmatprep.mubr.msk.bf16.mxu0 %vm393_vm0, %v392_v0  ;;  %370 = vmatprep.mubr.msk.bf16.mxu1 %vm393_vm0, %v392_v0 }
  0x1e   :  { %355 = vmatmul.mubr.msk.bf16.gmra.mrb[8].mxu0 %vm92_vm1, %v389_v8  ;;  %371 = vmatmul.mubr.msk.bf16.gmra.mrb[8].mxu1 %vm92_vm1, %v390_v9 }
  0x1f   :  { %358 = vmatprep.mubr.msk.bf16.mxu0 %vm393_vm0, %v392_v0 }
  0x26   :  { %359 = vmatmul.mubr.msk.bf16.gmra.mrb[12].mxu0 %vm92_vm1, %v391_v10 }
  0xe1   :  { %v148_v12 = vpop.f32.mrb[0].mxu0  ;;  %v180_v13 = vpop.f32.mrb[0].mxu1 }
  0xe2   :  { %v149_v14 = vadd.f32 %v461_v11, %v148_v12  ;;  %v348_v15 = vpop.f32.mrb[1].mxu0  ;;  %v181_v16 = vadd.f32 %v461_v11, %v180_v13  ;;  %v364_v17 = vpop.f32.mrb[1].mxu1 }
  0xe3   :  { %v151_v18 = vpop.f32.mrb[2].mxu0  ;;  %v183_v19 = vpop.f32.mrb[2].mxu1 }
  0xe4   :  { %v202_v20 = vmax.f32 %v149_v14, 0.0  ;;  %v152_v21 = vadd.f32 %v461_v11, %v151_v18  ;;  %v349_v22 = vpop.f32.mrb[3].mxu0  ;;  %v210_v23 = vmax.f32 %v181_v16, 0.0  ;;  %v184_v24 = vadd.f32 %v461_v11, %v183_v19  ;;  %v365_v25 = vpop.f32.mrb[3].mxu1 }
  0xe6   :  { %v317_v26 = vpack.c.bf16 %v202_v20, %v202_v20  ;;  %v203_v27 = vmax.f32 %v152_v21, 0.0  ;;  %v325_v28 = vpack.c.bf16 %v210_v23, %v210_v23  ;;  %v211_v29 = vmax.f32 %v184_v24, 0.0 }
  0xe8   :  { %269 = vst.msk [vmem:[%s531_s3] sm:$0xf] %vm268_vm2, %v317_v26  ;;  %v318_v30 = vpack.c.bf16 %v203_v27, %v203_v27  ;;  %277 = vst.msk [vmem:[%s531_s3 + $0x20] sm:$0xf] %vm268_vm2, %v325_v28  ;;  %v326_v31 = vpack.c.bf16 %v211_v29, %v211_v29 }
  0xe9   :  { %v156_v32 = vpop.f32.mrb[4].mxu0  ;;  %v188_v33 = vpop.f32.mrb[4].mxu1 }
  0xea   :  { %270 = vst.msk [vmem:[%s531_s3 + $0x4] sm:$0xf] %vm268_vm2, %v318_v30  ;;  %v157_v34 = vadd.f32 %v461_v11, %v156_v32  ;;  %v352_v35 = vpop.f32.mrb[5].mxu0  ;;  %278 = vst.msk [vmem:[%s531_s3 + $0x24] sm:$0xf] %vm268_vm2, %v326_v31  ;;  %v189_v36 = vadd.f32 %v461_v11, %v188_v33  ;;  %v368_v37 = vpop.f32.mrb[5].mxu1 }
  0xeb   :  { %v159_v38 = vpop.f32.mrb[6].mxu0  ;;  %v191_v39 = vpop.f32.mrb[6].mxu1 }
  0xec   :  { %v204_v40 = vmax.f32 %v157_v34, 0.0  ;;  %v160_v41 = vadd.f32 %v461_v11, %v159_v38  ;;  %v353_v42 = vpop.f32.mrb[7].mxu0  ;;  %v212_v43 = vmax.f32 %v189_v36, 0.0  ;;  %v192_v44 = vadd.f32 %v461_v11, %v191_v39  ;;  %v369_v45 = vpop.f32.mrb[7].mxu1 }
  0xee   :  { %v319_v46 = vpack.c.bf16 %v204_v40, %v204_v40  ;;  %v205_v47 = vmax.f32 %v160_v41, 0.0  ;;  %v327_v48 = vpack.c.bf16 %v212_v43, %v212_v43  ;;  %v213_v49 = vmax.f32 %v192_v44, 0.0 }
  0xf0   :  { %271 = vst.msk [vmem:[%s531_s3 + $0x8] sm:$0xf] %vm268_vm2, %v319_v46  ;;  %v320_v50 = vpack.c.bf16 %v205_v47, %v205_v47  ;;  %279 = vst.msk [vmem:[%s531_s3 + $0x28] sm:$0xf] %vm268_vm2, %v327_v48  ;;  %v328_v51 = vpack.c.bf16 %v213_v49, %v213_v49 }
  0xf1   :  { %v164_v52 = vpop.f32.mrb[8].mxu0  ;;  %v196_v53 = vpop.f32.mrb[8].mxu1 }
  0xf2   :  { %272 = vst.msk [vmem:[%s531_s3 + $0xc] sm:$0xf] %vm268_vm2, %v320_v50  ;;  %v165_v54 = vadd.f32 %v461_v11, %v164_v52  ;;  %v356_v55 = vpop.f32.mrb[9].mxu0  ;;  %280 = vst.msk [vmem:[%s531_s3 + $0x2c] sm:$0xf] %vm268_vm2, %v328_v51  ;;  %v197_v56 = vadd.f32 %v461_v11, %v196_v53  ;;  %v372_v57 = vpop.f32.mrb[9].mxu1 }
  0xf3   :  { %v167_v58 = vpop.f32.mrb[10].mxu0  ;;  %v199_v59 = vpop.f32.mrb[10].mxu1 }
  0xf4   :  { %v206_v60 = vmax.f32 %v165_v54, 0.0  ;;  %v168_v61 = vadd.f32 %v461_v11, %v167_v58  ;;  %v357_v62 = vpop.f32.mrb[11].mxu0  ;;  %v214_v63 = vmax.f32 %v197_v56, 0.0  ;;  %v373_v0 = vpop.f32.mrb[11].mxu1 }
  0xf6   :  { %v321_v1 = vpack.c.bf16 %v206_v60, %v206_v60  ;;  %v207_v2 = vmax.f32 %v168_v61, 0.0  ;;  %v329_v3 = vpack.c.bf16 %v214_v63, %v214_v63 }
  0xf8   :  { %273 = vst.msk [vmem:[%s531_s3 + $0x10] sm:$0xf] %vm268_vm2, %v321_v1  ;;  %v322_v4 = vpack.c.bf16 %v207_v2, %v207_v2  ;;  %281 = vst.msk [vmem:[%s531_s3 + $0x30] sm:$0xf] %vm268_vm2, %v329_v3 }
  0xf9   :  { %v172_v5 = vpop.f32.mrb[12].mxu0 }
  0xfa   :  { %274 = vst.msk [vmem:[%s531_s3 + $0x14] sm:$0xf] %vm268_vm2, %v322_v4  ;;  %v173_v6 = vadd.f32 %v461_v11, %v172_v5  ;;  %v360_v7 = vpop.f32.mrb[13].mxu0 }
  0xfb   :  { %v175_v8 = vpop.f32.mrb[14].mxu0 }
  0xfc   :  { %v208_v9 = vmax.f32 %v173_v6, 0.0  ;;  %v176_v10 = vadd.f32 %v461_v11, %v175_v8  ;;  %v361_v12 = vpop.f32.mrb[15].mxu0 }
  0xfe   :  { %v323_v13 = vpack.c.bf16 %v208_v9, %v208_v9  ;;  %v209_v14 = vmax.f32 %v176_v10, 0.0 }
 0x100   :  { %275 = vst.msk [vmem:[%s531_s3 + $0x18] sm:$0xf] %vm268_vm2, %v323_v13  ;;  %v324_v15 = vpack.c.bf16 %v209_v14, %v209_v14 }
 0x102   :  { %276 = vst.msk [vmem:[%s531_s3 + $0x1c] sm:$0xf] %vm268_vm2, %v324_v15 }

</bundles_post_ra>
